<compile_context>
chip_gen: v7x
topology: tpu7x:2x2x1
jax: 0.10.0
libtpu: 0.0.40
codegen_flags: <defaults>
</compile_context>

<pallas_src>
import functools

import numpy as np
import jax
import jax.numpy as jnp
from jax import lax
from jax.experimental import pallas as pl
from jax.experimental.pallas import tpu as pltpu

F32 = jnp.float32
BF16 = jnp.bfloat16
LN_EPS = 1e-5
NEG_BIG = -1e30          # large-negative mask value (exp underflows to 0)
VMEM_LIMIT = 48 * 1024 * 1024   # safe on v5e/v6e (128 MiB phys) and v7x (64 MiB)


# --------------------------------------------------------------------------
# Tiling helpers: pad-to-tile instead of divisor hunting.
# --------------------------------------------------------------------------
def _round_up(n, m):
    return ((n + m - 1) // m) * m


def _pick_row_tile(M, target=512):
    """Row tile for 2-D [M, D] work; prefers >=2 tiles for v7x megacore."""
    tm = min(_round_up(M, 8), target)
    if M > 8 and _round_up(M, tm) // tm < 2:
        tm = _round_up((M + 1) // 2, 8)
    return max(tm, 8)


def _pick_batch_block(B, T, target_rows=512):
    """Batch block for the attention kernel (~target_rows rows per step)."""
    bb = max(1, target_rows // max(T, 1))
    bb = min(bb, B)
    if bb >= B and B > 1:           # keep >=2 grid steps for v7x's 2 TCs
        bb = (B + 1) // 2
    return max(bb, 1)


def _pick_df_tile(DF, cap=512):
    if DF <= cap:
        return DF
    for t in range(cap, 127, -128):
        if DF % t == 0:
            return t
    # TODO(synk): pad DF to a 128 multiple instead of falling back to full DF.
    return DF


# --------------------------------------------------------------------------
# Embedder: fused cbfv gather (one-hot matmul; vocab is tiny) + fc_mat2vec.
# --------------------------------------------------------------------------
def _embed_kernel(ids_ref, cbfv_ref, w_ref, b_ref, o_ref, *, vocab):
    ids = ids_ref[...]                                        # [TM, 1] int32
    col = lax.broadcasted_iota(jnp.int32, (ids.shape[0], vocab), 1)
    onehot = (col == ids).astype(F32)                         # [TM, vocab]
    emb = jnp.dot(onehot, cbfv_ref[...], preferred_element_type=F32)
    o_ref[...] = (jnp.dot(emb.astype(BF16), w_ref[...],
                          preferred_element_type=F32) + b_ref[...])


def embed_pallas(src, cbfv, fc_w, fc_b):
    B, T = src.shape
    vocab, feat = cbfv.shape
    dm = fc_w.shape[1]
    M = B * T

    vocab_pad = _round_up(vocab, 8)
    if vocab_pad != vocab:
        cbfv = jnp.pad(cbfv, ((0, vocab_pad - vocab), (0, 0)))

    ids = src.reshape(M, 1).astype(jnp.int32)
    TM = _pick_row_tile(M, target=512)
    M_pad = _round_up(M, TM)
    if M_pad != M:
        ids = jnp.pad(ids, ((0, M_pad - M), (0, 0)))     # pad id 0 -> zero row
    nm = M_pad // TM

    out = pl.pallas_call(
        functools.partial(_embed_kernel, vocab=vocab_pad),
        out_shape=jax.ShapeDtypeStruct((M_pad, dm), F32),
        grid=(nm,),
        in_specs=[
            pl.BlockSpec((TM, 1), lambda m: (m, 0)),
            pl.BlockSpec((vocab_pad, feat), lambda m: (0, 0)),
            pl.BlockSpec((feat, dm), lambda m: (0, 0)),
            pl.BlockSpec((1, dm), lambda m: (0, 0)),
        ],
        out_specs=pl.BlockSpec((TM, dm), lambda m: (m, 0)),
        compiler_params=pltpu.CompilerParams(
            dimension_semantics=("parallel",),
            vmem_limit_bytes=VMEM_LIMIT),
    )(ids, cbfv, fc_w, fc_b.reshape(1, dm))
    return out[:M].reshape(B, T, dm)


# --------------------------------------------------------------------------
# Fused per-layer kernel #1:
#   fused-QKV attention (stoich-biased, z-scored) + key-padding mask +
#   softmax + AV + single out-proj + (optional frac_mlp bias) + residual + LN1
# --------------------------------------------------------------------------
def _zscore(x, n, eps=1e-5):
    # torch: (x - mean) / (std + eps), unbiased std (divide by n-1).
    mean = jnp.mean(x, axis=-1, keepdims=True)
    var = jnp.sum((x - mean) ** 2, axis=-1, keepdims=True) * (
        1.0 / float(max(n - 1, 1)))
    std = jnp.sqrt(var)
    return (x - mean) / (std + eps)


def _attn_ln_kernel(x_ref, pad_ref, wqkv_ref, bqkv_ref, wo_ref, bo_ref,
                    g1_ref, beta1_ref, *rest,
                    nhead, head_dim, scale, alpha_pos, alpha_neg,
                    gamma, delta, add_frac_bias, T, BB, dm):
    if add_frac_bias:
        (frac_ref, d_ref, fw1_ref, fb1_ref, fw2_ref, fb2_ref, o_ref) = rest
    else:
        (o_ref,) = rest

    rows = BB * T
    x = x_ref[...]                                            # [BB, T, dm] f32
    x2 = x.reshape(rows, dm)

    # One fused QKV projection (bf16 operands, f32 accumulation).
    qkv = jnp.dot(x2.astype(BF16), wqkv_ref[...],
                  preferred_element_type=F32) + bqkv_ref[...]  # [rows, 3*dm]

    pad = pad_ref[...]                                        # [BB, 1, T]
    if add_frac_bias:
        D = d_ref[...]                                        # [BB, T, T]
        d_pos = jnp.maximum(D, 0.0)
        d_neg = jnp.minimum(D, 0.0)                           # == -relu(-D)

    # Per-head attention.  T / head_dim are tiny in this model, so the per-head
    # score matmuls are negligible; the heavy matmuls (QKV / out-proj) are
    # already fused above/below.  No [BB,H,T,T] stack is materialized and the
    # head outputs are concatenated in registers (no VMEM scratch round-trip).
    head_outs = []
    for h in range(nhead):
        qh = qkv[:, h * head_dim:(h + 1) * head_dim].reshape(BB, T, head_dim)
        kh = qkv[:, dm + h * head_dim:dm + (h + 1) * head_dim].reshape(
            BB, T, head_dim)
        vh = qkv[:, 2 * dm + h * head_dim:2 * dm + (h + 1) * head_dim].reshape(
            BB, T, head_dim)

        logits = jnp.einsum('bqd,bkd->bqk', qh, kh,
                            preferred_element_type=F32) * scale
        attn = gamma * _zscore(logits, T)
        if add_frac_bias:
            bias = float(alpha_pos[h]) * d_pos + float(alpha_neg[h]) * d_neg
            attn = attn + delta * _zscore(bias, T)

        # key_padding_mask (applied after z-score, as in torch).
        attn = jnp.where(pad > 0.5, NEG_BIG, attn)

        m = jnp.max(attn, axis=-1, keepdims=True)
        p = jnp.exp(attn - m)
        probs = p * pl.reciprocal(jnp.sum(p, axis=-1, keepdims=True),
                                  approx=True)
        out_h = jnp.einsum('bqk,bkd->bqd', probs, vh,
                           preferred_element_type=F32)
        head_outs.append(out_h.reshape(rows, head_dim))

    heads = jnp.concatenate(head_outs, axis=-1)               # [rows, dm]
    attn_out = jnp.dot(heads.astype(BF16), wo_ref[...],
                       preferred_element_type=F32) + bo_ref[...]
    h1 = x2 + attn_out

    if add_frac_bias:
        # frac_mlp: Linear(1, dm) -> ReLU -> Linear(dm, dm)
        f = frac_ref[...].reshape(rows, 1)
        hb = jnp.maximum(f * fw1_ref[...] + fb1_ref[...], 0.0)
        h1 = h1 + jnp.dot(hb.astype(BF16), fw2_ref[...],
                          preferred_element_type=F32) + fb2_ref[...]

    # LayerNorm 1 (biased variance, like nn.LayerNorm).
    mean = jnp.mean(h1, axis=-1, keepdims=True)
    var = jnp.mean((h1 - mean) ** 2, axis=-1, keepdims=True)
    y = (h1 - mean) * lax.rsqrt(var + LN_EPS) * g1_ref[...] + beta1_ref[...]
    o_ref[...] = y.reshape(BB, T, dm)


def attn_ln_pallas(x, frac3, Dmat, pad, lp, add_frac_bias):
    B, T, dm = x.shape
    nhead = lp["nhead"]
    hd = dm // nhead

    BB = _pick_batch_block(B, T)
    B_pad = _round_up(B, BB)
    pb = B_pad - B
    if pb:
        # Padded batch rows: x=0, mask=0 (unmasked) so softmax stays finite;
        # results for pad rows are sliced off below.
        x = jnp.pad(x, ((0, pb), (0, 0), (0, 0)))
        pad = jnp.pad(pad, ((0, pb), (0, 0), (0, 0)))
    nb = B_pad // BB

    kern = functools.partial(
        _attn_ln_kernel,
        nhead=nhead, head_dim=hd, scale=float(hd) ** -0.5,
        alpha_pos=tuple(float(a) for a in lp["alpha_pos"]),
        alpha_neg=tuple(float(a) for a in lp["alpha_neg"]),
        gamma=float(lp["gamma"]), delta=float(lp["delta"]),
        add_frac_bias=add_frac_bias, T=T, BB=BB, dm=dm)

    def rep(shape):
        return pl.BlockSpec(shape, lambda b: (0, 0))

    in_specs = [
        pl.BlockSpec((BB, T, dm), lambda b: (b, 0, 0)),       # x
        pl.BlockSpec((BB, 1, T), lambda b: (b, 0, 0)),        # pad mask
        rep((dm, 3 * dm)), rep((1, 3 * dm)),                  # fused QKV
        rep((dm, dm)), rep((1, dm)),                          # out_proj
        rep((1, dm)), rep((1, dm)),                           # LN1 gamma/beta
    ]
    operands = [x, pad,
                lp["wqkv"], lp["bqkv"].reshape(1, 3 * dm),
                lp["wo"], lp["bo"].reshape(1, dm),
                lp["ln1_w"].reshape(1, dm), lp["ln1_b"].reshape(1, dm)]

    if add_frac_bias:
        if pb:
            frac3 = jnp.pad(frac3, ((0, pb), (0, 0), (0, 0)),
                            constant_values=1.0)
            Dmat = jnp.pad(Dmat, ((0, pb), (0, 0), (0, 0)))
        in_specs += [
            pl.BlockSpec((BB, T, 1), lambda b: (b, 0, 0)),    # frac
            pl.BlockSpec((BB, T, T), lambda b: (b, 0, 0)),    # Dmat
            rep((1, dm)), rep((1, dm)),                       # frac_mlp L1
            rep((dm, dm)), rep((1, dm)),                      # frac_mlp L2
        ]
        operands += [frac3, Dmat,
                     lp["fm_w1"], lp["fm_b1"].reshape(1, dm),
                     lp["fm_w2"], lp["fm_b2"].reshape(1, dm)]

    out = pl.pallas_call(
        kern,
        out_shape=jax.ShapeDtypeStruct((B_pad, T, dm), F32),
        grid=(nb,),
        in_specs=in_specs,
        out_specs=pl.BlockSpec((BB, T, dm), lambda b: (b, 0, 0)),
        compiler_params=pltpu.CompilerParams(
            dimension_semantics=("parallel",),
            vmem_limit_bytes=VMEM_LIMIT),
    )(*operands)
    return out[:B] if pb else out


# --------------------------------------------------------------------------
# Fused per-layer kernel #2:
#   MoE top-2 FFN + residual + LayerNorm2.
#   Grid = (row tiles, experts, DF chunks): expert weights stream one bf16
#   block at a time (DF-tiled so VMEM stays bounded on v7x), a VMEM accumulator
#   carries residual + weighted expert outputs, LN2 on the last reduction step.
# --------------------------------------------------------------------------
def _moe_ln_kernel(x_ref, wg_ref, bg_ref, w1_ref, b1_ref, w2_ref, b2_ref,
                   g2_ref, beta2_ref, o_ref, acc_ref, gate_ref, *,
                   num_experts, n_df):
    e = pl.program_id(1)
    f = pl.program_id(2)
    x = x_ref[...]                                            # [TM, D] f32

    @pl.when(jnp.logical_and(e == 0, f == 0))
    def _():
        logits = jnp.dot(x, wg_ref[...], preferred_element_type=F32) + bg_ref[...]
        m = jnp.max(logits, axis=-1, keepdims=True)
        p = jnp.exp(logits - m)
        scores = p / jnp.sum(p, axis=-1, keepdims=True)       # [TM, E]
        # top-2 keep mask via second-largest score (full-width, O(E))
        top1 = jnp.max(scores, axis=-1, keepdims=True)
        second = jnp.max(jnp.where(scores < top1, scores, NEG_BIG),
                         axis=-1, keepdims=True)
        keep = (scores >= second).astype(F32)
        # TODO(synk): exact torch.topk tie-breaking on equal gate scores is not
        # reproduced (measure-zero for float inputs); no renormalization, as torch.
        gate_ref[...] = scores * keep
        acc_ref[...] = x                                      # residual term

    # per-expert gate weight: full-width masked row reduction (no 1-lane slices)
    col = lax.broadcasted_iota(jnp.int32, (x.shape[0], num_experts), 1)
    w_e = jnp.sum(jnp.where(col == e, gate_ref[...], 0.0),
                  axis=-1, keepdims=True)                     # [TM, 1]

    # TODO(synk): non-top-2 experts still run their matmuls with w_e == 0; with
    # large row tiles a whole-tile skip rarely triggers, so the real saving is a
    # token-sorted (grouped) MoE layout via scalar prefetch, not implemented here.
    hidden = jnp.maximum(
        jnp.dot(x.astype(BF16), w1_ref[0], preferred_element_type=F32)
        + b1_ref[0], 0.0)                                     # [TM, TDF]
    y = jnp.dot(hidden.astype(BF16), w2_ref[0], preferred_element_type=F32)
    b2_scale = jnp.where(f == 0, 1.0, 0.0)                    # add b2 once/expert
    acc_ref[...] += w_e * (y + b2_scale * b2_ref[0])

    @pl.when(jnp.logical_and(e == num_experts - 1, f == n_df - 1))
    def _():
        a = acc_ref[...]
        mean = jnp.mean(a, axis=-1, keepdims=True)
        var = jnp.mean((a - mean) ** 2, axis=-1, keepdims=True)
        o_ref[...] = ((a - mean) * lax.rsqrt(var + LN_EPS) * g2_ref[...]
                      + beta2_ref[...])


def moe_ln_pallas(x2d, lp):
    M, D = x2d.shape
    E = lp["num_experts"]
    DF = lp["ew1"].shape[2]

    TM = _pick_row_tile(M, target=1024)
    M_pad = _round_up(M, TM)
    if M_pad != M:
        x2d = jnp.pad(x2d, ((0, M_pad - M), (0, 0)))
    nm = M_pad // TM

    TDF = _pick_df_tile(DF)
    ndf = DF // TDF

    kern = functools.partial(_moe_ln_kernel, num_experts=E, n_df=ndf)
    out = pl.pallas_call(
        kern,
        out_shape=jax.ShapeDtypeStruct((M_pad, D), F32),
        grid=(nm, E, ndf),
        in_specs=[
            pl.BlockSpec((TM, D), lambda m, e, f: (m, 0)),        # x tile
            pl.BlockSpec((D, E), lambda m, e, f: (0, 0)),         # gate W
            pl.BlockSpec((1, E), lambda m, e, f: (0, 0)),         # gate b
            pl.BlockSpec((1, D, TDF), lambda m, e, f: (e, 0, f)),  # expert W1
            pl.BlockSpec((1, 1, TDF), lambda m, e, f: (e, 0, f)),  # expert b1
            pl.BlockSpec((1, TDF, D), lambda m, e, f: (e, f, 0)),  # expert W2
            pl.BlockSpec((1, 1, D), lambda m, e, f: (e, 0, 0)),    # expert b2
            pl.BlockSpec((1, D), lambda m, e, f: (0, 0)),          # LN2 gamma
            pl.BlockSpec((1, D), lambda m, e, f: (0, 0)),          # LN2 beta
        ],
        out_specs=pl.BlockSpec((TM, D), lambda m, e, f: (m, 0)),
        scratch_shapes=[pltpu.VMEM((TM, D), F32), pltpu.VMEM((TM, E), F32)],
        compiler_params=pltpu.CompilerParams(
            dimension_semantics=("parallel", "arbitrary", "arbitrary"),
            vmem_limit_bytes=VMEM_LIMIT),
    )(x2d, lp["wg"], lp["bg"].reshape(1, E),
      lp["ew1"], lp["eb1"], lp["ew2"], lp["eb2"],
      lp["ln2_w"].reshape(1, D), lp["ln2_b"].reshape(1, D))
    return out[:M]


# --------------------------------------------------------------------------
# Parameter init (deterministic, shapes from the module __init__)
# --------------------------------------------------------------------------
def init_params(d_model, nhead, dff, num_experts, feat_size, vocab):
    rng = np.random.RandomState(0)

    def lin(fan_in, fan_out):
        bound = 1.0 / np.sqrt(fan_in)
        w = rng.uniform(-bound, bound, size=(fan_in, fan_out)).astype(np.float32)
        b = rng.uniform(-bound, bound, size=(fan_out,)).astype(np.float32)
        return w, b                       # stored as (in, out) = torch W.T

    cbfv = rng.uniform(-1.0, 1.0, size=(vocab, feat_size)).astype(np.float32)
    cbfv[0, :] = 0.0                      # padding row, like the module
    fc_w, fc_b = lin(feat_size, d_model)

    wq, bq = lin(d_model, d_model)
    wk, bk = lin(d_model, d_model)
    wv, bv = lin(d_model, d_model)
    wo, bo = lin(d_model, d_model)
    wqkv = np.concatenate([wq, wk, wv], axis=1)          # fused QKV weight
    bqkv = np.concatenate([bq, bk, bv], axis=0)

    fm_w1, fm_b1 = lin(1, d_model)
    fm_w2, fm_b2 = lin(d_model, d_model)

    wg, bg = lin(d_model, num_experts)
    ew1 = np.stack([lin(d_model, dff)[0] for _ in range(num_experts)])
    eb1 = rng.uniform(-0.1, 0.1, size=(num_experts, 1, dff)).astype(np.float32)
    ew2 = np.stack([lin(dff, d_model)[0] for _ in range(num_experts)])
    eb2 = rng.uniform(-0.1, 0.1, size=(num_experts, 1, d_model)).astype(np.float32)

    # Large matmul operands are stored in bf16 (f32 accumulation in-kernel);
    # biases / LN / gate / elementwise weights stay f32.
    layer = dict(
        nhead=nhead,
        wqkv=jnp.asarray(wqkv, BF16), bqkv=jnp.asarray(bqkv, F32),
        wo=jnp.asarray(wo, BF16), bo=jnp.asarray(bo, F32),
        # module inits alphas to zeros / gamma=1 / delta=0.2; use small nonzero
        # alphas so the stoich-bias path is actually exercised.
        alpha_pos=np.linspace(0.05, 0.2, nhead).astype(np.float32),
        alpha_neg=np.linspace(-0.2, -0.05, nhead).astype(np.float32),
        gamma=1.0, delta=0.2,
        ln1_w=jnp.ones((d_model,), F32), ln1_b=jnp.zeros((d_model,), F32),
        ln2_w=jnp.ones((d_model,), F32), ln2_b=jnp.zeros((d_model,), F32),
        fm_w1=jnp.asarray(fm_w1, F32), fm_b1=jnp.asarray(fm_b1, F32),
        fm_w2=jnp.asarray(fm_w2, BF16), fm_b2=jnp.asarray(fm_b2, F32),
        wg=jnp.asarray(wg, F32), bg=jnp.asarray(bg, F32),
        ew1=jnp.asarray(ew1, BF16), eb1=jnp.asarray(eb1, F32),
        ew2=jnp.asarray(ew2, BF16), eb2=jnp.asarray(eb2, F32),
        num_experts=num_experts,
    )
    return dict(cbfv=jnp.asarray(cbfv, F32), fc_w=jnp.asarray(fc_w, BF16),
                fc_b=jnp.asarray(fc_b, F32), layer=layer)


# --------------------------------------------------------------------------
# Forward pass
# --------------------------------------------------------------------------
def encoder_layer_forward(lp, src, frac3, Dmat, pad, add_frac_bias):
    B, T, dm = src.shape
    h = attn_ln_pallas(src, frac3, Dmat, pad, lp, add_frac_bias)
    return moe_ln_pallas(h.reshape(B * T, dm), lp).reshape(B, T, dm)


def encoder_forward(params, src, frac, num_layers):
    B, T = src.shape
    d_model = params["fc_w"].shape[1]

    # Embedder: fused cbfv gather + projection (tiled over rows).
    x = embed_pallas(src, params["cbfv"], params["fc_w"], params["fc_b"])

    pad = (src == 0).astype(F32).reshape(B, 1, T)             # key_padding_mask
    fi = frac[:, :, None]
    fj = frac[:, None, :]
    Dmat = ((fj - fi) / (fi * fj + 1e-8)).astype(F32)         # [B, T, T]
    frac3 = frac[:, :, None].astype(F32)                      # [B, T, 1]

    lp = params["layer"]   # same layer object reused for every depth (as in torch)
    out = x
    for i in range(num_layers):
        out = encoder_layer_forward(lp, out, frac3, Dmat, pad,
                                    add_frac_bias=(i == 0))
    return out


# --------------------------------------------------------------------------
if __name__ == "__main__":
    B, T = 2, 8
    d_model, nhead, N_layers = 32, 4, 2
    dff, num_experts = 2048, 4     # dim_feedforward=2048 is hardcoded in the module
    feat_size, vocab = 64, 12      # synthetic mat2vec table (row 0 = padding zeros)

    key = jax.random.PRNGKey(0)
    k1, k2 = jax.random.split(key)
    src = jax.random.randint(k1, (B, T), 1, vocab)
    src = src.at[:, -1].set(0)     # one padded position per batch element
    frac = jax.random.uniform(k2, (B, T), minval=0.05, maxval=1.0).astype(F32)

    params = init_params(d_model, nhead, dff, num_experts, feat_size, vocab)

    out = encoder_forward(params, src, frac, N_layers)
    out = jax.block_until_ready(out)

    assert out.shape == (B, T, d_model)
    assert bool(jnp.all(jnp.isfinite(out)))
    print("KERNEL_OK")
</pallas_src>

<mosaic_0001>
module attributes {stable_mosaic.version = 11 : i64} {
  func.func @_embed_kernel(%arg0: i32, %arg1: memref<8x1xi32, #tpu.memory_space<vmem>>, %arg2: memref<16x64xf32, #tpu.memory_space<vmem>>, %arg3: memref<64x32xbf16, #tpu.memory_space<vmem>>, %arg4: memref<1x32xf32, #tpu.memory_space<vmem>>, %arg5: memref<8x32xf32, #tpu.memory_space<vmem>>) attributes {dimension_semantics = [#tpu.dimension_semantics<parallel>], iteration_bounds = array<i64: 2>, scalar_prefetch = 0 : i64, scratch_operands = 0 : i64, tpu.core_type = #tpu.core_type<tc>, window_params = [{transform_indices = @transform_0, window_bounds = array<i64: 8, 1>}, {pipeline_mode = #tpu.pipeline_mode<synchronous>, transform_indices = @transform_1, window_bounds = array<i64: 16, 64>}, {pipeline_mode = #tpu.pipeline_mode<synchronous>, transform_indices = @transform_2, window_bounds = array<i64: 64, 32>}, {pipeline_mode = #tpu.pipeline_mode<synchronous>, transform_indices = @transform_3, window_bounds = array<i64: 1, 32>}, {transform_indices = @transform_4, window_bounds = array<i64: 8, 32>}]} {
    %c0 = arith.constant 0 : index
    %c0_0 = arith.constant 0 : index
    %0 = vector.load %arg1[%c0, %c0_0] : memref<8x1xi32, #tpu.memory_space<vmem>>, vector<8x1xi32>
    %1 = tpu.iota {dimensions = array<i32: 1>} : vector<8x16xi32>
    %2 = vector.broadcast %0 : vector<8x1xi32> to vector<8x16xi32>
    %3 = arith.cmpi eq, %1, %2 : vector<8x16xi32>
    %4 = arith.extui %3 : vector<8x16xi1> to vector<8x16xi32>
    %5 = arith.sitofp %4 : vector<8x16xi32> to vector<8x16xf32>
    %c0_1 = arith.constant 0 : index
    %c0_2 = arith.constant 0 : index
    %6 = vector.load %arg2[%c0_1, %c0_2] : memref<16x64xf32, #tpu.memory_space<vmem>>, vector<16x64xf32>
    %cst = arith.constant dense<0.000000e+00> : vector<8x64xf32>
    %7 = tpu.matmul %5, %6, %cst {dimension_numbers = #tpu.dot_dimension_numbers<[1], [0], [0], [1], [0, 0, 1, 1], [], []>} : vector<8x16xf32>, vector<16x64xf32>, vector<8x64xf32> -> vector<8x64xf32>
    %8 = arith.truncf %7 : vector<8x64xf32> to vector<8x64xbf16>
    %c0_3 = arith.constant 0 : index
    %c0_4 = arith.constant 0 : index
    %9 = vector.load %arg3[%c0_3, %c0_4] : memref<64x32xbf16, #tpu.memory_space<vmem>>, vector<64x32xbf16>
    %cst_5 = arith.constant dense<0.000000e+00> : vector<8x32xf32>
    %10 = tpu.matmul %8, %9, %cst_5 {dimension_numbers = #tpu.dot_dimension_numbers<[1], [0], [0], [1], [0, 0, 1, 1], [], []>} : vector<8x64xbf16>, vector<64x32xbf16>, vector<8x32xf32> -> vector<8x32xf32>
    %c0_6 = arith.constant 0 : index
    %c0_7 = arith.constant 0 : index
    %11 = vector.load %arg4[%c0_6, %c0_7] : memref<1x32xf32, #tpu.memory_space<vmem>>, vector<1x32xf32>
    %12 = vector.broadcast %11 : vector<1x32xf32> to vector<8x32xf32>
    %13 = arith.addf %10, %12 : vector<8x32xf32>
    %c0_8 = arith.constant 0 : index
    %c0_9 = arith.constant 0 : index
    %14 = vector.load %arg5[%c0_8, %c0_9] : memref<8x32xf32, #tpu.memory_space<vmem>>, vector<8x32xf32>
    tpu.vector_store %arg5[%c0_8, %c0_9], %13 {strides = array<i32>} : memref<8x32xf32, #tpu.memory_space<vmem>>, vector<8x32xf32>,
    return
  }
  func.func @transform_0(%arg0: i32) -> (i32, i32) {
    %c0_i32 = arith.constant 0 : i32
    %c0_i32_0 = arith.constant 0 : i32
    return %arg0, %c0_i32 : i32, i32
  }
  func.func @transform_1(%arg0: i32) -> (i32, i32) {
    %c0_i32 = arith.constant 0 : i32
    %c0_i32_0 = arith.constant 0 : i32
    %c0_i32_1 = arith.constant 0 : i32
    return %c0_i32, %c0_i32_0 : i32, i32
  }
  func.func @transform_2(%arg0: i32) -> (i32, i32) {
    %c0_i32 = arith.constant 0 : i32
    %c0_i32_0 = arith.constant 0 : i32
    %c0_i32_1 = arith.constant 0 : i32
    return %c0_i32, %c0_i32_0 : i32, i32
  }
  func.func @transform_3(%arg0: i32) -> (i32, i32) {
    %c0_i32 = arith.constant 0 : i32
    %c0_i32_0 = arith.constant 0 : i32
    %c0_i32_1 = arith.constant 0 : i32
    return %c0_i32, %c0_i32_0 : i32, i32
  }
  func.func @transform_4(%arg0: i32) -> (i32, i32) {
    %c0_i32 = arith.constant 0 : i32
    %c0_i32_0 = arith.constant 0 : i32
    return %arg0, %c0_i32 : i32, i32
  }
}

</mosaic_0001>

<bundles_post_ra>
// kernel: tpu_custom_call.1
= control target key start
LH: loop header
LB: loop body
LE: loop exit
PB: predicated region body
PF: predicated region fallthrough
CT: control target
= control target key end

     0   :  { %9 = vsyncpa [#allocation3], 0  ;;  %s749_s0 = inlined_call_operand.vmem [shape: s32[16,1], index: 0, kind: input, shape index: {}]   ;;  %s750_s1 = inlined_call_operand.vmem [shape: f32[16,64], index: 1, kind: input, shape index: {}]   ;;  %s751_s2 = inlined_call_operand.vmem [shape: bf16[64,32], index: 2, kind: input, shape index: {}]   ;;  %s752_s3 = inlined_call_operand.vmem [shape: f32[1,32], index: 3, kind: input, shape index: {}]   ;;  %s753_s4 = inlined_call_operand.hbm [shape: f32[16,32], index: 4, kind: output, shape index: {}]  }
   0x1   :  { %11 = vsyncpa [#allocation3 + $0x1], 0  ;;  %s628_s15 = smov 0   ;;  %s630_s16 = smov 0  }
   0x2   :  { %s632_s17 = smov 0   ;;  %s634_s18 = smov 0  }
   0x3 LB: > { %s649_s19 = sadd.s32 4294967295, %s596_s18   ;;  %s438_s20 = sadd.s32 4294967294, %s596_s18   ;;  %s596_s18 = sphi %s634_s18, %s759_s18   ;;  %s592_s17 = sphi %s632_s17, %s758_s17   ;;  %s588_s16 = sphi %s630_s16, %s757_s16   ;;  %s584_s15 = sphi %s628_s15, %s756_s15  }
   0x4   : > { %s653_s21 = sadd.s32 1, %s596_s18   ;;  %s113_s22 = sadd.s32 1, %s592_s17 }
   0x5   : > { %s110_s23 = ssub.s32 %s596_s18, %s653_s21  ;;  %p123_p0 = scmp.ne.s32.totalorder %s592_s17, %s588_s16 }
   0x6   : > { %p111_p1 = scmp.eq.s32.totalorder %s110_s23, 0  ;;  %p124_p2 = scmp.eq.s32.totalorder %s649_s19, 1 }
   0x7   : > { %p129_p3 = scmp.ne.s32.totalorder %s588_s16, %s584_s15  ;;  %p130_p4 = scmp.eq.s32.totalorder %s438_s20, 1 }
   0x8   : > { %s664_s24 = scalar_select %p111_p1, %s592_s17, %s113_s22  }
   0x9   : > { %p666_p5 = por %p124_p2, %p123_p0  ;;  %p670_p6 = por %p130_p4, %p129_p3 }
   0xa   : > { %p441_p7 = scmp.ge.s32.totalorder %s596_s18, 1  ;;  %p164_p8 = scmp.lt.s32.totalorder %s596_s18, 3 }
   0xc   : > { %p165_p9 = pnand %p441_p7, %p164_p8 }
   0xd   : > { %p189_p10 = scmp.lt.s32.totalorder (!%p165_p9), %s649_s19, 1  ;;  %v203_v0 = vld [vmem:[%s750_s1] sm:$0xff] (!%p165_p9)  ;;  %v204_v1 = vld [vmem:[%s750_s1 + $0x8] sm:$0xff] (!%p165_p9)  ;;  %v598_v2 = vmov (!%p165_p9), 0   ;;  %v599_v3 = vmov (!%p165_p9), 0.0|0.0   ;;  %v600_v5 = vmov (!%p165_p9), 0.0   ;;  %v195_v10 = vlaneseq (!%p165_p9) }
   0xe   : > { %168 = sbr.rel (%p165_p9) target bundleno = 598 (0x256), region = 36  ;;  %529 = vset.pattern.permute.xlu0 (!%p165_p9), %v598_v2  ;;  %483 = vmatprep.subr.bf16.mxu0 (!%p165_p9), %v599_v3  ;;  %v484_v4 = vpack.c.bf16 (!%p165_p9), %v204_v1, %v203_v0  ;;  %vm601_vm0 = vmmov (!%p165_p9), 0   ;;  %v530_v7 = vld [vmem:[%s751_s2] sm:$0xff] (!%p165_p9)   ;;  %v531_v8 = vld [vmem:[%s751_s2 + $0x8] sm:$0xff] (!%p165_p9)   ;;  %v532_v9 = vld [vmem:[%s751_s2 + $0x10] sm:$0xff] (!%p165_p9)   ;;  %vm205_vm1 = vcmask (!%p165_p9), 130048  }
   0xf   : > { %471 = vmatprep.subr.bf16.mxu1 (!%p165_p9), %v600_v5  ;;  %468 = vmatprep.mubr.msk.f32.mxu0 (!%p165_p9), %vm601_vm0, %v600_v5  ;;  %v196_v11 = vand.u32 (!%p165_p9), 127, %v195_v10  ;;  %v533_v14 = vld [vmem:[%s751_s2 + $0x18] sm:$0xff] (!%p165_p9)   ;;  %vm319_vm3 = vcmask (!%p165_p9), 523264   ;;  %s186_s27 = sand.u32 (!%p165_p9), 1, %s588_s16   ;;  %v446_v18 = vld [vmem:[%s752_s3] ss:$0 sm:$0xff] (!%p165_p9) }
  0x10   : > { %485 = vmatpush3.bf16.msra.mxu0 (!%p165_p9), %v484_v4  ;;  %479 = vmatprep.mubr.msk.bf16.mxu1 (!%p165_p9), %vm601_vm0, %v600_v5  ;;  %s442_s28 = sshll.u32 (!%p165_p9), %s186_s27, 3  ;;  %vm363_vm4 = vcmask (!%p165_p9), 261120   ;;  %s602_s12 = smov (!%p165_p9), [#allocation2]  }
  0x11   : > { %472 = vmatpush3.bf16.msra.mxu1 (!%p165_p9), %v530_v7  ;;  %s538_s13 = sshll.u32 (!%p165_p9), %s602_s12, 4  ;;  %s539_s13 = int_to_ptr.vmem [resolvable:$false] %s538_s13 }
  0x12   : > { %473 = vmatprep.subr.bf16.mxu1 (!%p165_p9), %v600_v5  ;;  %s540_s14 = scalar_lea.vmem (!%p165_p9), %s539_s13, 256 }
  0x15   : > { %s190_s5 = scalar_select %p189_p10, %s649_s19, 1  ;;  %474 = vmatpush3.bf16.msra.mxu1 %v531_v8 }
  0x16   : > { %475 = vmatprep.subr.bf16.mxu1 %v600_v5 }
  0x17   : > { %s443_s6 = sshll.u32 %s190_s5, 3  ;;  %s453_s5 = sshll.u32 %s649_s19, 7 }
  0x18   : > { %s192_s9 = scalar_lea.vmem %s749_s0, %s443_s6  ;;  %s188_s6 = scalar_lea.vmem [#allocation2], %s442_s28 }
  0x19   : > { %v194_v6 = vld [vmem:[%s192_s9] sm:$0xff]  ;;  %476 = vmatpush3.bf16.msra.mxu1 %v532_v9  ;;  %s379_s7 = sshll.u32 %s188_s6, 4  ;;  %s707_s10 = scalar_lea.hbm %s753_s4, %s453_s5  ;;  %s709_s7 = int_to_ptr.vmem [resolvable:$true] %s379_s7 }
  0x1a   : > { %198 = vperm.xlu0 %529, %v194_v6   ;;  %477 = vmatprep.subr.bf16.mxu1 %v600_v5  ;;  %s366_s19 = scalar_lea.sflag [#allocation3], %s186_s27  ;;  %s534_s11 = scalar_lea.vmem %s709_s7, 128 }
  0x1b   : > { %p535_p11 = scmp.ne.s32.totalorder %s709_s7, %s534_s11  ;;  %p541_p0 = scmp.lt.s32.totalorder %s709_s7, %s539_s13 }
  0x1c   : > { %p542_p1 = scmp.lt.s32.totalorder %s540_s14, %s534_s11 }
  0x1d   : > { %478 = vmatpush3.bf16.msra.mxu1 %v533_v14  ;;  %p536_p12 = pnand %p535_p11, %p666_p5 }
  0x1e   : > { %p543_p2 = por %p542_p1, %p541_p0 }
  0x1f   : > { %p537_p13 = pneg %p536_p12 }
  0x21   : > { %p544_p3 = pnand %p543_p2, %p537_p13 }
  0x99   : > { %v199_v12 = vpop.permute.xlu0 %198 }
  0x9a   : > { %vm200_vm2 = vcmp.eq.s32.totalorder %v196_v11, %v199_v12 }
  0x9b   : > { %v444_v13 = vsel %vm200_vm2, 1.0, %v600_v5 }
  0x9c   : > { %469 = vmatmul.mubr.msk.f32.vlgmr.msra.gmra.mrb[0].mxu0 %vm205_vm1, %v444_v13 }
 0x16f   : > { %v275_v15 = vpop.f32.mrb[0].mxu0 }
 0x170   : > { %v279_v16 = vpack.c.bf16 %v275_v15, %v275_v15  ;;  %v470_v17 = vpop.f32.mrb[1].mxu0 }
 0x172   : > { %480 = vmatmul.mubr.msk.bf16.vlgmr.msra.gmra.mrb[0].mxu1 %vm319_vm3, %v279_v16 }
 0x245   : > { %v357_v19 = vpop.f32.mrb[0].mxu1 }
 0x246   : > { %v358_v20 = vadd.f32 %v446_v18, %v357_v19  ;;  %v481_v21 = vpop.f32.mrb[1].mxu1 }
 0x247   : > { %v360_v22 = vpop.f32.mrb[2].mxu1 }
 0x248   : > { %v482_v23 = vpop.f32.mrb[3].mxu1  ;;  %364 = vst.msk [vmem:[%s188_s6] sm:$0xff] %vm363_vm4, %v358_v20 }
 0x249   : > { %547 = shalt.err (!%p544_p3)
}
 0x24a   : > { %s548_s20 = scalar_lea.hbm %s707_s10, 128  ;;  %s552_s27 = scalar_lea.hbm %s753_s4, 256 }
 0x24b   : > { %p549_p4 = scmp.ne.s32.totalorder %s707_s10, %s548_s20  ;;  %p553_p9 = scmp.lt.u32.totalorder %s707_s10, %s753_s4 }
 0x24c   : > { %p554_p10 = scmp.lt.u32.totalorder %s552_s27, %s548_s20  ;;  %p556_p12 = scmp.lt.u32.totalorder %s548_s20, %s707_s10 }
 0x24d   : > { %p550_p7 = pnand %p549_p4, %p666_p5 }
 0x24e   : > { %p555_p11 = por %p554_p10, %p553_p9 }
 0x24f   : > { %p551_p8 = pneg %p550_p7 }
 0x250   : > { %p557_p13 = por %p556_p12, %p555_p11 }
 0x252   : > { %p558_p0 = pnand %p557_p13, %p551_p8 }
 0x254   : > { %561 = shalt.err (!%p558_p0)
}
 0x255   : > { %486 = dma.vmem_to_hbm [thread:$0]  (%p666_p5), %s709_s7, 128, %s707_s10, %s366_s19  }
 0x256 PF: > { %p492_p1 = scmp.ge.s32.totalorder %s596_s18, 2  ;;  %s391_s30 = sand.u32 1, %s584_s15  }
 0x257   : > { %s392_s5 = scalar_lea.sflag [#allocation3], %s391_s30 }
 0x258   : > { %p489_p2 = pnand %p492_p1, %p670_p6 }
 0x25a   : > { %579 = dma.done.wait (!%p489_p2), %s392_s5, 128  }
 0x25b   : > { %581 = vsyncadd (!%p489_p2), %s392_s5, 4294967168  ;;  %p14_p3 = scmp.ge.s32.totalorder %s653_s21, 4   ;;  %s756_s15 = smov %s588_s16 }
 0x25c   : > { %s757_s16 = smov %s592_s17  ;;  %s758_s17 = smov %s664_s24 }
 0x25d   : > { %s759_s18 = smov %s653_s21  ;;  %16 = sbr.rel (!%p14_p3) target bundleno = 3 (0x3), region = 71 }
 0x264   :  { %397 = vsyncpa [#allocation3], 1 }
 0x265   :  { %399 = vsyncpa [#allocation3 + $0x1], 1 }

</bundles_post_ra>
